<compile_context>
chip_gen: v6e
topology: v6e:2x2x1
jax: 0.10.0
libtpu: 0.0.40
codegen_flags: <defaults>
</compile_context>

<pallas_src>
import functools

import jax
import jax.numpy as jnp
from jax import lax
from jax.experimental import pallas as pl
from jax.experimental.pallas import tpu as pltpu

EPS = 1e-5


# ----------------------------------------------------------------------------
# Kernels
# ----------------------------------------------------------------------------
def _gct_fused_kernel(x_ref, p_ref, o_ref):
    """Single-pass GCT.  x_ref/o_ref: (Bn, C, HW); p_ref: (3, C, 1) f32."""
    alpha = p_ref[0]                                  # (C, 1)
    beta = p_ref[1]
    gamma = p_ref[2]

    # f32 only for the reduction; the big f32 copy is dead after `ss`.
    xf = x_ref[...].astype(jnp.float32)
    ss = jnp.sum(xf * xf, axis=-1, keepdims=True)     # (Bn, C, 1)
    embedding = jnp.sqrt(ss + EPS) * alpha            # (Bn, C, 1)
    mean_c = jnp.mean(embedding * embedding, axis=1, keepdims=True)
    norm = gamma * lax.rsqrt(mean_c + EPS)            # rsqrt -> EUP slot
    gate = 1.0 + jnp.tanh(embedding * norm + beta)    # (Bn, C, 1) f32

    # Apply in the native dtype; only the tiny gate is cast.
    o_ref[...] = x_ref[...] * gate.astype(o_ref.dtype)


def _gct_ss_kernel(x_ref, ss_ref, *, hw, thw):
    """Large-slab pass 1: accumulate sum-of-squares across HW tiles.
       x_ref: (1, C, Thw); ss_ref: (1, C, 1) f32, resident across the HW axis."""
    h = pl.program_id(1)

    @pl.when(h == 0)
    def _():
        ss_ref[...] = jnp.zeros_like(ss_ref)

    xf = x_ref[...].astype(jnp.float32)
    # Mask the ragged tail of the last HW tile (OOB lanes hold stale garbage).
    col = lax.broadcasted_iota(jnp.int32, xf.shape, 2) + h * thw
    ss_ref[...] += jnp.sum(jnp.where(col < hw, xf * xf, 0.0),
                           axis=-1, keepdims=True)


def _gct_apply_kernel(x_ref, g_ref, o_ref):
    """Large-slab pass 2: o = x * gate (gate precomputed, (1, C, 1) f32)."""
    o_ref[...] = x_ref[...] * g_ref[...].astype(o_ref.dtype)


# ----------------------------------------------------------------------------
# Generation-aware sizing helpers
# ----------------------------------------------------------------------------
def _vmem_capacity_bytes():
    try:
        cap = getattr(pltpu.get_tpu_info(), "vmem_capacity_bytes", None)
        if cap:
            return int(cap)
    except Exception:
        pass
    return 64 << 20  # conservative (v7x per-TensorCore VMEM)


def _num_tensorcores():
    """Rough per-device TensorCore count: v5e/v6e -> 1, v4/v5p/v7x -> 2."""
    try:
        kind = jax.devices()[0].device_kind.lower()
        if "lite" in kind or "v5e" in kind or "v6e" in kind:
            return 1
        return 2
    except Exception:
        return 1


def _gen_aware_target(vmem_cap, itemsize):
    """Target bytes for one x block: in+out double-buffered (4x) plus ~1x f32
    reduce temp must fit in ~70% of physical VMEM."""
    usable = int(vmem_cap * 0.70)
    denom = 4.0 + (4.0 / itemsize)
    return max(1 << 20, int(usable / denom))


def _vmem_limit(block_bytes, itemsize, vmem_cap):
    est = 4 * block_bytes + (block_bytes * 4) // itemsize + (4 << 20)
    hi = int(vmem_cap * 0.85)            # never request all of physical VMEM
    return int(min(max(est, 32 << 20), hi))


def _pick_batch_block(n, slab_bytes, target_bytes, want_steps):
    """Largest Bn with Bn*slab_bytes <= target_bytes; Bn need not divide n
    (partial last block).  Keep >= want_steps grid steps when possible."""
    bn = max(1, min(n, target_bytes // max(slab_bytes, 1)))
    if want_steps > 1 and n > 1:
        bn = min(bn, max(1, -(-n // want_steps)))
    return int(bn)


# ----------------------------------------------------------------------------
# Wrapper
# ----------------------------------------------------------------------------
def gct_pallas(x_nchw, alpha, beta, gamma, *, block_budget_bytes=None):
    """x_nchw: [N, C, H, W]; alpha/beta/gamma: [1, C, 1, 1] (PyTorch shape)."""
    N, C, H, W = x_nchw.shape
    HW = H * W
    dtype = x_nchw.dtype
    itemsize = jnp.dtype(dtype).itemsize

    x = x_nchw.reshape(N, C, HW)
    vmem_cap = _vmem_capacity_bytes()
    target = (block_budget_bytes if block_budget_bytes is not None
              else _gen_aware_target(vmem_cap, itemsize))
    slab_bytes = C * HW * itemsize                     # one image's (C, HW) slab

    if slab_bytes <= target:
        # ---------------- fused single-pass path ----------------
        want_steps = 2 if _num_tensorcores() >= 2 else 1
        Bn = _pick_batch_block(N, slab_bytes, target, want_steps)
        params = jnp.stack(
            [alpha.reshape(C, 1).astype(jnp.float32),
             beta.reshape(C, 1).astype(jnp.float32),
             gamma.reshape(C, 1).astype(jnp.float32)], axis=0)  # (3, C, 1)

        out = pl.pallas_call(
            _gct_fused_kernel,
            out_shape=jax.ShapeDtypeStruct((N, C, HW), dtype),
            grid_spec=pltpu.PrefetchScalarGridSpec(
                num_scalar_prefetch=0,
                grid=(pl.cdiv(N, Bn),),
                in_specs=[
                    pl.BlockSpec((Bn, C, HW), lambda n: (n, 0, 0)),
                    pl.BlockSpec((3, C, 1), lambda n: (0, 0, 0)),
                ],
                out_specs=pl.BlockSpec((Bn, C, HW), lambda n: (n, 0, 0)),
            ),
            compiler_params=pltpu.CompilerParams(
                dimension_semantics=("parallel",),
                vmem_limit_bytes=_vmem_limit(Bn * slab_bytes, itemsize, vmem_cap)),
        )(x, params)
        return out.reshape(N, C, H, W)

    # ---------------- large-slab path: tile HW, two passes ----------------
    max_thw = max(128, ((target // max(C * itemsize, 1)) // 128) * 128)
    Thw = HW if HW <= max_thw else max_thw             # full-extent if it fits
    nhw = pl.cdiv(HW, Thw)
    tile_bytes = C * Thw * itemsize
    vmem_lim = _vmem_limit(tile_bytes, itemsize, vmem_cap)

    # Pass 1: per-(n, c) sum of squares over HW (f32 accumulator resident).
    ss = pl.pallas_call(
        functools.partial(_gct_ss_kernel, hw=HW, thw=Thw),
        out_shape=jax.ShapeDtypeStruct((N, C, 1), jnp.float32),
        grid_spec=pltpu.PrefetchScalarGridSpec(
            num_scalar_prefetch=0,
            grid=(N, nhw),
            in_specs=[pl.BlockSpec((1, C, Thw), lambda n, h: (n, 0, h))],
            out_specs=pl.BlockSpec((1, C, 1), lambda n, h: (n, 0, 0)),
        ),
        compiler_params=pltpu.CompilerParams(
            dimension_semantics=("parallel", "arbitrary"),
            vmem_limit_bytes=vmem_lim),
    )(x)

    # Tiny gate math on (N, C, 1) — negligible vs. the two HBM passes over x.
    a = alpha.reshape(1, C, 1).astype(jnp.float32)
    b = beta.reshape(1, C, 1).astype(jnp.float32)
    g = gamma.reshape(1, C, 1).astype(jnp.float32)
    embedding = jnp.sqrt(ss + EPS) * a
    mean_c = jnp.mean(embedding * embedding, axis=1, keepdims=True)
    norm = g * lax.rsqrt(mean_c + EPS)
    gate = 1.0 + jnp.tanh(embedding * norm + b)        # (N, C, 1) f32

    # Pass 2: apply the gate per HW tile.
    out = pl.pallas_call(
        _gct_apply_kernel,
        out_shape=jax.ShapeDtypeStruct((N, C, HW), dtype),
        grid_spec=pltpu.PrefetchScalarGridSpec(
            num_scalar_prefetch=0,
            grid=(N, nhw),
            in_specs=[
                pl.BlockSpec((1, C, Thw), lambda n, h: (n, 0, h)),
                pl.BlockSpec((1, C, 1), lambda n, h: (n, 0, 0)),
            ],
            out_specs=pl.BlockSpec((1, C, Thw), lambda n, h: (n, 0, h)),
        ),
        compiler_params=pltpu.CompilerParams(
            dimension_semantics=("parallel", "parallel"),
            vmem_limit_bytes=vmem_lim),
    )(x, gate)
    return out.reshape(N, C, H, W)


# ----------------------------------------------------------------------------
# Pure-JAX reference (mirrors the PyTorch module)
# ----------------------------------------------------------------------------
def gct_reference(x, alpha, beta, gamma, eps=EPS):
    embedding = jnp.sqrt(jnp.sum(x ** 2, axis=(2, 3), keepdims=True) + eps) * alpha
    norm = gamma / jnp.sqrt(jnp.mean(embedding ** 2, axis=1, keepdims=True) + eps)
    gate = 1.0 + jnp.tanh(embedding * norm + beta)
    return x * gate


if __name__ == "__main__":
    key = jax.random.PRNGKey(0)
    kx, ka, kb, kg, kx2, kx3 = jax.random.split(key, 6)

    # 1) Module-consistent small shape, default init (alpha=1, beta=0, gamma=0
    #    -> gate == 1 exactly).
    N, C, H, W = 2, 4, 16, 16
    x = jax.random.normal(kx, (N, C, H, W), dtype=jnp.float32)
    alpha0 = jnp.ones((1, C, 1, 1), jnp.float32)
    beta0 = jnp.zeros((1, C, 1, 1), jnp.float32)
    gamma0 = jnp.zeros((1, C, 1, 1), jnp.float32)
    out0 = jax.block_until_ready(gct_pallas(x, alpha0, beta0, gamma0))
    ref0 = gct_reference(x, alpha0, beta0, gamma0)
    assert jnp.allclose(out0, ref0, atol=1e-5, rtol=1e-5)

    # 2) Non-trivial params exercise the full gating math (fused path).
    alpha = jax.random.normal(ka, (1, C, 1, 1), dtype=jnp.float32)
    beta = jax.random.normal(kb, (1, C, 1, 1), dtype=jnp.float32)
    gamma = jax.random.normal(kg, (1, C, 1, 1), dtype=jnp.float32)
    out = jax.block_until_ready(gct_pallas(x, alpha, beta, gamma))
    ref = gct_reference(x, alpha, beta, gamma)
    assert jnp.allclose(out, ref, atol=1e-4, rtol=1e-4)

    # 3) HW = 49 (not a multiple of 128): ragged lane tail, no pad / no slice.
    N2, C2, H2, W2 = 3, 8, 7, 7
    x2 = jax.random.normal(kx2, (N2, C2, H2, W2), dtype=jnp.float32)
    a2 = jax.random.normal(ka, (1, C2, 1, 1), dtype=jnp.float32)
    b2 = jax.random.normal(kb, (1, C2, 1, 1), dtype=jnp.float32)
    g2 = jax.random.normal(kg, (1, C2, 1, 1), dtype=jnp.float32)
    out2 = jax.block_until_ready(gct_pallas(x2, a2, b2, g2))
    ref2 = gct_reference(x2, a2, b2, g2)
    assert jnp.allclose(out2, ref2, atol=1e-4, rtol=1e-4)

    # 4) Force the large-slab (HW-tiled, two-phase) path with a tiny budget:
    #    HW = 196 -> tiles of 128 + ragged tail of 68.
    N3, C3, H3, W3 = 2, 4, 14, 14
    x3 = jax.random.normal(kx3, (N3, C3, H3, W3), dtype=jnp.float32)
    a3 = jax.random.normal(ka, (1, C3, 1, 1), dtype=jnp.float32)
    b3 = jax.random.normal(kb, (1, C3, 1, 1), dtype=jnp.float32)
    g3 = jax.random.normal(kg, (1, C3, 1, 1), dtype=jnp.float32)
    out3 = jax.block_until_ready(
        gct_pallas(x3, a3, b3, g3, block_budget_bytes=1024))
    ref3 = gct_reference(x3, a3, b3, g3)
    assert jnp.allclose(out3, ref3, atol=1e-4, rtol=1e-4)

    # 5) bf16 input: reductions/gate in f32, apply in bf16 (loose tolerance).
    xb = x.astype(jnp.bfloat16)
    outb = jax.block_until_ready(gct_pallas(xb, alpha, beta, gamma))
    refb = gct_reference(xb.astype(jnp.float32), alpha, beta, gamma)
    assert jnp.allclose(outb.astype(jnp.float32), refb, atol=5e-2, rtol=5e-2)

    print("KERNEL_OK")
</pallas_src>

<mosaic_0001>
module attributes {stable_mosaic.version = 11 : i64} {
  func.func @_gct_fused_kernel(%arg0: i32, %arg1: memref<1x4x256xf32, #tpu.memory_space<vmem>>, %arg2: memref<3x4x1xf32, #tpu.memory_space<vmem>>, %arg3: memref<1x4x256xf32, #tpu.memory_space<vmem>>) attributes {dimension_semantics = [#tpu.dimension_semantics<parallel>], iteration_bounds = array<i64: 2>, scalar_prefetch = 0 : i64, scratch_operands = 0 : i64, tpu.core_type = #tpu.core_type<tc>, window_params = [{transform_indices = @transform_0, window_bounds = array<i64: 1, 4, 256>}, {pipeline_mode = #tpu.pipeline_mode<synchronous>, transform_indices = @transform_1, window_bounds = array<i64: 3, 4, 1>}, {transform_indices = @transform_2, window_bounds = array<i64: 1, 4, 256>}]} {
    %c0 = arith.constant 0 : index
    %c0_0 = arith.constant 0 : index
    %c0_1 = arith.constant 0 : index
    %0 = vector.load %arg2[%c0, %c0_0, %c0_1] : memref<3x4x1xf32, #tpu.memory_space<vmem>>, vector<1x4x1xf32>
    %1 = vector.shape_cast %0 : vector<1x4x1xf32> to vector<4x1xf32>
    %c1 = arith.constant 1 : index
    %c0_2 = arith.constant 0 : index
    %c0_3 = arith.constant 0 : index
    %2 = vector.load %arg2[%c1, %c0_2, %c0_3] : memref<3x4x1xf32, #tpu.memory_space<vmem>>, vector<1x4x1xf32>
    %3 = vector.shape_cast %2 : vector<1x4x1xf32> to vector<4x1xf32>
    %c2 = arith.constant 2 : index
    %c0_4 = arith.constant 0 : index
    %c0_5 = arith.constant 0 : index
    %4 = vector.load %arg2[%c2, %c0_4, %c0_5] : memref<3x4x1xf32, #tpu.memory_space<vmem>>, vector<1x4x1xf32>
    %5 = vector.shape_cast %4 : vector<1x4x1xf32> to vector<4x1xf32>
    %c0_6 = arith.constant 0 : index
    %c0_7 = arith.constant 0 : index
    %c0_8 = arith.constant 0 : index
    %6 = vector.load %arg1[%c0_6, %c0_7, %c0_8] : memref<1x4x256xf32, #tpu.memory_space<vmem>>, vector<1x4x256xf32>
    %7 = arith.mulf %6, %6 : vector<1x4x256xf32>
    %cst = arith.constant dense<0.000000e+00> : vector<1x4xf32>
    %8 = vector.multi_reduction <add>, %7, %cst [2] : vector<1x4x256xf32> to vector<1x4xf32>
    %9 = vector.shape_cast %8 : vector<1x4xf32> to vector<1x4x1xf32>
    %cst_9 = arith.constant 9.99999974E-6 : f32
    %10 = vector.broadcast %cst_9 : f32 to vector<1x4x1xf32>
    %11 = arith.addf %9, %10 : vector<1x4x1xf32>
    %12 = math.sqrt %11 : vector<1x4x1xf32>
    %13 = vector.shape_cast %1 : vector<4x1xf32> to vector<1x4x1xf32>
    %14 = arith.mulf %12, %13 : vector<1x4x1xf32>
    %15 = arith.mulf %14, %14 : vector<1x4x1xf32>
    %cst_10 = arith.constant dense<0.000000e+00> : vector<1x1xf32>
    %16 = vector.multi_reduction <add>, %15, %cst_10 [1] : vector<1x4x1xf32> to vector<1x1xf32>
    %17 = vector.shape_cast %16 : vector<1x1xf32> to vector<1x1x1xf32>
    %cst_11 = arith.constant 4.000000e+00 : f32
    %18 = vector.broadcast %cst_11 : f32 to vector<1x1x1xf32>
    %19 = arith.divf %17, %18 : vector<1x1x1xf32>
    %cst_12 = arith.constant 9.99999974E-6 : f32
    %20 = vector.broadcast %cst_12 : f32 to vector<1x1x1xf32>
    %21 = arith.addf %19, %20 : vector<1x1x1xf32>
    %22 = math.rsqrt %21 : vector<1x1x1xf32>
    %23 = vector.shape_cast %5 : vector<4x1xf32> to vector<1x4x1xf32>
    %24 = vector.broadcast %22 : vector<1x1x1xf32> to vector<1x4x1xf32>
    %25 = arith.mulf %23, %24 : vector<1x4x1xf32>
    %26 = arith.mulf %14, %25 : vector<1x4x1xf32>
    %27 = vector.shape_cast %3 : vector<4x1xf32> to vector<1x4x1xf32>
    %28 = arith.addf %26, %27 : vector<1x4x1xf32>
    %29 = math.tanh %28 : vector<1x4x1xf32>
    %cst_13 = arith.constant 1.000000e+00 : f32
    %30 = vector.broadcast %cst_13 : f32 to vector<1x4x1xf32>
    %31 = arith.addf %30, %29 : vector<1x4x1xf32>
    %c0_14 = arith.constant 0 : index
    %c0_15 = arith.constant 0 : index
    %c0_16 = arith.constant 0 : index
    %32 = vector.load %arg1[%c0_14, %c0_15, %c0_16] : memref<1x4x256xf32, #tpu.memory_space<vmem>>, vector<1x4x256xf32>
    %33 = vector.broadcast %31 : vector<1x4x1xf32> to vector<1x4x256xf32>
    %34 = arith.mulf %32, %33 : vector<1x4x256xf32>
    %c0_17 = arith.constant 0 : index
    %c0_18 = arith.constant 0 : index
    %c0_19 = arith.constant 0 : index
    %35 = vector.load %arg3[%c0_17, %c0_18, %c0_19] : memref<1x4x256xf32, #tpu.memory_space<vmem>>, vector<1x4x256xf32>
    tpu.vector_store %arg3[%c0_17, %c0_18, %c0_19], %34 {strides = array<i32>} : memref<1x4x256xf32, #tpu.memory_space<vmem>>, vector<1x4x256xf32>,
    return
  }
  func.func @transform_0(%arg0: i32) -> (i32, i32, i32) {
    %c0_i32 = arith.constant 0 : i32
    %c0_i32_0 = arith.constant 0 : i32
    %c0_i32_1 = arith.constant 0 : i32
    return %arg0, %c0_i32, %c0_i32_0 : i32, i32, i32
  }
  func.func @transform_1(%arg0: i32) -> (i32, i32, i32) {
    %c0_i32 = arith.constant 0 : i32
    %c0_i32_0 = arith.constant 0 : i32
    %c0_i32_1 = arith.constant 0 : i32
    %c0_i32_2 = arith.constant 0 : i32
    return %c0_i32, %c0_i32_0, %c0_i32_1 : i32, i32, i32
  }
  func.func @transform_2(%arg0: i32) -> (i32, i32, i32) {
    %c0_i32 = arith.constant 0 : i32
    %c0_i32_0 = arith.constant 0 : i32
    %c0_i32_1 = arith.constant 0 : i32
    return %arg0, %c0_i32, %c0_i32_0 : i32, i32, i32
  }
}

</mosaic_0001>

<bundles_post_ra>
// kernel: tpu_custom_call.1
= control target key start
LH: loop header
LB: loop body
LE: loop exit
PB: predicated region body
PF: predicated region fallthrough
CT: control target
= control target key end

     0   :  { %7 = vsyncpa [#allocation3], 0  ;;  %s642_s0 = inlined_call_operand.hbm [shape: f32[2,4,256], index: 0, kind: input, shape index: {}]   ;;  %s643_s1 = inlined_call_operand.vmem [shape: f32[3,4,1], index: 1, kind: input, shape index: {}]   ;;  %s644_s2 = inlined_call_operand.hbm [shape: f32[2,4,256], index: 2, kind: output, shape index: {}]  }
   0x1   :  { %9 = vsyncpa [#allocation3 + $0x1], 0 }
   0x2   :  { %10 = vsyncpa [#allocation4], 0 }
   0x3   :  { %12 = vsyncpa [#allocation4 + $0x1], 0  ;;  %s488_s9 = smov 0   ;;  %s490_s10 = smov 0  }
   0x4   :  { %s492_s11 = smov 0   ;;  %s494_s12 = smov 0  }
   0x5 LB: > { %s509_s13 = sadd.s32 4294967295, %s467_s12   ;;  %s302_s14 = sadd.s32 4294967294, %s467_s12   ;;  %s467_s12 = sphi %s494_s12, %s661_s12   ;;  %s463_s11 = sphi %s492_s11, %s660_s11   ;;  %s459_s10 = sphi %s490_s10, %s659_s10   ;;  %s455_s9 = sphi %s488_s9, %s658_s9  }
   0x6   : > { %s513_s15 = sadd.s32 1, %s467_s12   ;;  %s25_s16 = sadd.s32 1, %s463_s11 }
   0x7   : > { %s22_s17 = ssub.s32 %s467_s12, %s513_s15  ;;  %p32_p0 = scmp.ne.s32.totalorder %s463_s11, %s459_s10 }
   0x8   : > { %p23_p1 = scmp.eq.s32.totalorder %s22_s17, 0  ;;  %p33_p2 = scmp.eq.s32.totalorder %s467_s12, 0 }
   0x9   : > { %p38_p3 = scmp.ne.s32.totalorder %s459_s10, %s455_s9  ;;  %p39_p4 = scmp.eq.s32.totalorder %s509_s13, 0 }
   0xa   : > { %s525_s18 = scalar_select %p23_p1, %s463_s11, %s25_s16  }
   0xb   : > { %p527_p5 = por %p33_p2, %p32_p0  ;;  %p531_p6 = por %p39_p4, %p38_p3 }
   0xc   : > { %p83_p7 = scmp.eq.s32.totalorder %s509_s13, 1  ;;  %p89_p8 = scmp.eq.s32.totalorder %s302_s14, 1 }
   0xd   : > { %s648_s20 = scalar_select %p531_p6, 1, 0 }
   0xe   : > { %p332_p10 = scmp.lt.s32.totalorder %s467_s12, 2  ;;  %p538_p11 = por %p83_p7, %p32_p0 }
   0xf   : > { %p542_p12 = por %p89_p8, %p38_p3  ;;  %s112_s23 = sand.u32 1, %s463_s11  }
  0x10   : > { %s649_s21 = scalar_select %p538_p11, 1, 0 }
  0x11   : > { %s650_s22 = scalar_select %p542_p12, 1, 0 }
  0x12   : > { %s318_s24 = sshll.u32 %s467_s12, 7  ;;  %s305_s25 = sshll.u32 %s112_s23, 3 }
  0x13   : > { %s551_s28 = scalar_lea.hbm %s642_s0, %s318_s24  ;;  %s116_s29 = scalar_lea.vmem [#allocation2], %s305_s25 }
  0x14   : > { %s124_s30 = sshll.u32 %s116_s29, 4  ;;  %p555_p13 = pnand %p332_p10, %p527_p5  ;;  %s559_s30 = int_to_ptr.vmem [resolvable:$true] %s124_s30 }
  0x15   : > { %s113_s4 = scalar_lea.sflag [#allocation3], %s112_s23  ;;  %s375_s5 = scalar_lea.hbm %s551_s28, 128 }
  0x16   : > { %p376_p2 = scmp.ne.s32.totalorder %s551_s28, %s375_s5  ;;  %p377_p3 = pneg %p555_p13 }
  0x17   : > { %s380_s8 = scalar_lea.hbm %s642_s0, 256  ;;  %p381_p5 = scmp.lt.s32.totalorder %s551_s28, %s642_s0 }
  0x18   : > { %p378_p4 = pnand %p377_p3, %p376_p2  ;;  %p382_p8 = scmp.lt.s32.totalorder %s380_s8, %s375_s5 }
  0x1a   : > { %p379_p7 = pneg %p378_p4  ;;  %p383_p10 = por %p382_p8, %p381_p5 }
  0x1c   : > { %p384_p9 = pnand %p383_p10, %p379_p7 }
  0x1e   : > { %387 = shalt.err (!%p384_p9)
}
  0x1f   : > { %s388_s17 = scalar_lea.vmem %s559_s30, 128  ;;  %s469_s19 = smov [#allocation2]  }
  0x20   : > { %p389_p0 = scmp.ne.s32.totalorder %s559_s30, %s388_s17  ;;  %s393_s23 = sshll.u32 %s469_s19, 4  ;;  %s394_s23 = int_to_ptr.vmem [resolvable:$false] %s393_s23 }
  0x21   : > { %s395_s24 = scalar_lea.vmem %s394_s23, 256  ;;  %p396_p4 = scmp.lt.s32.totalorder %s559_s30, %s394_s23 }
  0x22   : > { %p391_p1 = pnand %p389_p0, %p377_p3  ;;  %p397_p12 = scmp.lt.s32.totalorder %s395_s24, %s388_s17 }
  0x24   : > { %p392_p2 = pneg %p391_p1  ;;  %p398_p11 = por %p397_p12, %p396_p4 }
  0x26   : > { %p399_p6 = pnand %p398_p11, %p392_p2 }
  0x28   : > { %402 = shalt.err (!%p399_p6)
}
  0x29   : > { %327 = dma.hbm_to_vmem [thread:$0]  (!%p555_p13), %s551_s28, 128, %s559_s30, %s113_s4  }
  0x2a   : > { %p652_p9 = scmp.lt.s32.totalorder %s467_s12, 3  ;;  %p653_p7 = scmp.ge.s32.totalorder %s467_s12, 1 }
  0x2c   : > { %p130_p0 = pnand %p653_p7, %p652_p9 }
  0x2d   : > { %s586_s25 = sand.u32 (!%p130_p0), 1, %s459_s10   ;;  %p654_p6 = scmp.ne.s32.totalorder (!%p130_p0), %s648_s20, 0 }
  0x2e   : > { %133 = sbr.rel (%p130_p0) target bundleno = 416 (0x1a0), region = 28  ;;  %s309_s26 = sshll.u32 (!%p130_p0), %s586_s25, 3 }
  0x2f   : > { %s136_s27 = scalar_lea.sflag (!%p130_p0), [#allocation3], %s586_s25  ;;  %s139_s29 = scalar_lea.vmem (!%p130_p0), [#allocation2], %s309_s26 }
  0x33   : > { %446 = dma.done.wait (%p654_p6), %s136_s27, 128  }
  0x34   : > { %448 = vsyncadd (%p654_p6), %s136_s27, 4294967168  ;;  %v165_v0 = vld [vmem:[%s139_s29] sm:$0xff]  ;;  %vm170_vm0 = vcmask 1043456   ;;  %v470_v6 = vmov 0   ;;  %vm186_vm3 = vcmask 3072   ;;  %v210_v36 = vlaneseq  ;;  %s319_s6 = sshll.u32 %s509_s13, 7 }
  0x35   : > { %v166_v1 = vmul.f32 %v165_v0, %v165_v0  ;;  %368 = vset.pattern.permute.xlu0 %v470_v6  ;;  %v160_v11 = vld [vmem:[%s643_s1] sm:$0xf]  ;;  %v312_v26 = vld [vmem:[%s643_s1 + $0x8] sm:$0xf]  ;;  %v311_v29 = vld [vmem:[%s643_s1 + $0x4] sm:$0xf]  ;;  %s230_s17 = scalar_lea.hbm %s644_s2, %s319_s6 }
  0x36   : > { %v471_v34 = vmov 839922192   ;;  %v211_v38 = vshrl.u32 %v210_v36, 7  ;;  %s159_s7 = scalar_lea.vmem [#allocation5], %s309_s26  ;;  %s218_s19 = scalar_lea.sflag [#allocation4], %s586_s25 }
  0x37   : > { %v168_v2 = vcombine.high %v166_v1, %v166_v1  ;;  %v171_v3 = vsel %vm170_vm0, %v166_v1, 0.0  ;;  %v208_v35 = vunpack.c.l.s4 %v471_v34  ;;  %s232_s8 = sshll.u32 %s159_s7, 4  ;;  %p655_p12 = scmp.ne.s32.totalorder %s649_s21, 0  ;;  %s233_s8 = int_to_ptr.vmem [resolvable:$true] %s232_s8 }
  0x38   : > { %s403_s23 = scalar_lea.vmem %s233_s8, 128  ;;  %s472_s24 = smov [#allocation5]  }
  0x39   : > { %v172_v4 = vsel %vm170_vm0, %v168_v2, 0.0  ;;  %v209_v37 = vunpack.c.0.s8 %v208_v35  ;;  %p404_p11 = scmp.ne.s32.totalorder %s233_s8, %s403_s23  ;;  %s407_s27 = sshll.u32 %s472_s24, 4  ;;  %s408_s27 = int_to_ptr.vmem [resolvable:$false] %s407_s27 }
  0x3a   : > { %v173_v5 = vadd.f32 %v172_v4, %v171_v3  ;;  %s409_s13 = scalar_lea.vmem %s408_s27, 256  ;;  %p410_p3 = scmp.lt.s32.totalorder %s233_s8, %s408_s27 }
  0x3b   : > { %v212_v39 = vsub.s32 %v209_v37, %v211_v38  ;;  %p405_p13 = pnand %p404_p11, %p655_p12  ;;  %p411_p5 = scmp.lt.s32.totalorder %s409_s13, %s403_s23 }
  0x3c   : > { %174 = vadd.xlane.f32.xlu0 %v173_v5 }
  0x3d   : > { %p406_p1 = pneg %p405_p13  ;;  %p412_p8 = por %p411_p5, %p410_p3 }
  0x3f   : > { %p413_p10 = pnand %p412_p8, %p406_p1 }
  0xc5   : > { %v175_v7 = vpop.xlane.xlu0 %174 }
  0xc6   : > { %v176_v8 = vadd.f32 1e-05, %v175_v7 }
  0xc8   : > { %369 = vrsqrt.f32 %v176_v8  ;;  %vm179_vm1 = vcmp.eq.f32.partialorder %v176_v8, inf  ;;  %v182_v12 = vand.u32 2147483648, %v176_v8  ;;  %vm181_vm2 = vcmp.eq.f32.partialorder %v176_v8, 0.0 }
  0xd5   : > { %v370_v9 = vpop.eup %369 }
  0xd6   : > { %v178_v10 = vmul.f32 %v370_v9, %v176_v8 }
  0xd8   : > { %v180_v13 = vsel %vm179_vm1, %v176_v8, %v178_v10 }
  0xd9   : > { %v183_v14 = vsel %vm181_vm2, %v182_v12, %v180_v13 }
  0xda   : > { %v184_v15 = vmul.f32 %v183_v14, %v160_v11 }
  0xdc   : > { %v185_v16 = vmul.f32 %v184_v15, %v184_v15 }
  0xde   : > { %v187_v17 = vsel %vm186_vm3, %v185_v16, 0.0 }
  0xdf   : > { %v188_v18 = vrot.slane %v187_v17, 4 }
  0xe1   : > { %v189_v19 = vadd.f32 %v188_v18, %v187_v17 }
  0xe3   : > { %v190_v20 = vrot.slane %v189_v19, 2 }
  0xe5   : > { %v191_v21 = vadd.f32 %v190_v20, %v189_v19 }
  0xe7   : > { %v192_v22 = vrot.slane %v191_v21, 1 }
  0xe9   : > { %v193_v23 = vadd.f32 %v192_v22, %v191_v21 }
  0xeb   : > { %v195_v24 = vmul.f32 0.25, %v193_v23 }
  0xed   : > { %v196_v25 = vadd.f32 1e-05, %v195_v24 }
  0xef   : > { %371 = vrsqrt.f32 %v196_v25 }
  0xfc   : > { %v372_v27 = vpop.eup %371 }
  0xfd   : > { %v198_v28 = vmul.f32 %v372_v27, %v312_v26 }
  0xff   : > { %v199_v30 = vmul.f32 %v198_v28, %v184_v15 }
 0x101   : > { %v200_v31 = vadd.f32 %v311_v29, %v199_v30 }
 0x103   : > { %373 = vtanh.f32 %v200_v31 }
 0x110   : > { %v374_v32 = vpop.eup %373 }
 0x111   : > { %v202_v33 = vadd.f32 1.0, %v374_v32 }
 0x113   : > { %205 = vperm.xlu0 %368, %v202_v33  }
 0x18e   : > { %v206_v40 = vpop.permute.xlu0 %205 }
 0x18f   : > { %v213_v41 = vrot.slane %v206_v40, %v212_v39 }
 0x191   : > { %v215_v42 = vmul.f32 %v213_v41, %v165_v0 }
 0x193   : > { %216 = vst [vmem:[%s159_s7] sm:$0xff] %v215_v42 }
 0x194   : > { %416 = shalt.err (!%p413_p10)
}
 0x195   : > { %s417_s26 = scalar_lea.hbm %s230_s17, 128  ;;  %s421_s28 = scalar_lea.hbm %s644_s2, 256 }
 0x196   : > { %p418_p2 = scmp.ne.s32.totalorder %s230_s17, %s417_s26  ;;  %p422_p7 = scmp.lt.s32.totalorder %s230_s17, %s644_s2 }
 0x197   : > { %p423_p0 = scmp.lt.s32.totalorder %s421_s28, %s417_s26 }
 0x198   : > { %p419_p4 = pnand %p418_p2, %p655_p12 }
 0x199   : > { %p424_p6 = por %p423_p0, %p422_p7 }
 0x19a   : > { %p420_p9 = pneg %p419_p4 }
 0x19c   : > { %p425_p11 = pnand %p424_p6, %p420_p9 }
 0x19e   : > { %428 = shalt.err (!%p425_p11)
}
 0x19f   : > { %322 = dma.vmem_to_hbm [thread:$0]  (%p655_p12), %s233_s8, 128, %s230_s17, %s218_s19  }
 0x1a0 PF: > { %s244_s3 = sand.u32 1, %s455_s9   ;;  %p656_p13 = scmp.ne.s32.totalorder %s650_s22, 0 }
 0x1a1   : > { %p657_p1 = scmp.ge.s32.totalorder %s467_s12, 2  ;;  %s245_s4 = scalar_lea.sflag [#allocation4], %s244_s3 }
 0x1a3   : > { %p329_p3 = pnand %p657_p1, %p656_p13 }
 0x1a5   : > { %p330_p5 = pneg %p329_p3 }
 0x1a7   : > { %450 = dma.done.wait (%p330_p5), %s245_s4, 128  }
 0x1a8   : > { %452 = vsyncadd (%p330_p5), %s245_s4, 4294967168  ;;  %p15_p8 = scmp.ge.s32.totalorder %s513_s15, 4   ;;  %s658_s9 = smov %s459_s10 }
 0x1a9   : > { %s659_s10 = smov %s463_s11  ;;  %s660_s11 = smov %s525_s18 }
 0x1aa   : > { %s661_s12 = smov %s513_s15  ;;  %17 = sbr.rel (!%p15_p8) target bundleno = 5 (0x5), region = 75 }
 0x1af   :  { %250 = vsyncpa [#allocation3], 1 }
 0x1b0   :  { %252 = vsyncpa [#allocation3 + $0x1], 1 }
 0x1b1   :  { %253 = vsyncpa [#allocation4], 1 }
 0x1b2   :  { %255 = vsyncpa [#allocation4 + $0x1], 1 }

</bundles_post_ra>
